<compile_context>
chip_gen: v6e
topology: v6e:2x2x1
jax: 0.10.0
libtpu: 0.0.40
codegen_flags: <defaults>
</compile_context>

<pallas_src>
import math

import jax
import jax.numpy as jnp
from jax.experimental import pallas as pl
from jax.experimental.pallas import tpu as pltpu


# ---------------------------------------------------------------------------
# Kernel
# ---------------------------------------------------------------------------
def _make_lconv_kernel(K: int, P: int, T: int, has_bias: bool):
    """Kernel factory; K (taps), P (padding), T (timesteps), has_bias are static."""

    def kernel(x_ref, w_ref, *rest):
        # x_ref: (b_tile, c_tile, T)  input tile, native dtype (zero padding fused via roll+mask)
        # w_ref: (c_tile, K)          per-channel taps (head weights expanded to channels), f32
        # b_ref: (c_tile, 1)          bias tile (only when has_bias), f32
        # o_ref: (b_tile, c_tile, T)
        if has_bias:
            b_ref, o_ref = rest
        else:
            b_ref = None
            (o_ref,) = rest

        # Keep x in its native dtype through the rolls / masking (bf16 stays packed); cast to
        # f32 only at the MAC so the accumulator is f32 on every generation (v5e has no bf16 VPU).
        x = x_ref[...]                                            # (b_tile, c_tile, T)
        w = w_ref[...]                                            # (c_tile, K), f32
        t_idx = jax.lax.broadcasted_iota(jnp.int32, x.shape, 2)   # lane index, for halo masking

        acc = None
        for k in range(K):            # K is small and static -> fully unrolled
            d = k - P                 # out[t] += x[t + d] * w[:, k]
            if d == 0:
                xk = x
            else:
                # np.roll semantics: out[i] = in[(i - shift) % T]; shift = (-d) % T gives x[t+d].
                # TODO(synk): on v7x, if the bundle shows the XLU (vrot) slot saturating for
                # large K, switch these rolls to offset slices of a (T_tile + K-1) halo'd block.
                xk = pltpu.roll(x, shift=(-d) % T, axis=2)
                # Zero the lanes that wrapped around (these are the zero-padding positions).
                if d > 0:
                    valid = t_idx < (T - d)
                else:
                    valid = t_idx >= (-d)
                xk = jnp.where(valid, xk, jnp.zeros_like(xk))
            term = xk.astype(jnp.float32) * w[:, k:k + 1][None]   # (b,c,T) * (1,c,1), f32 MAC
            acc = term if acc is None else acc + term

        if has_bias:
            acc = acc + b_ref[...][None]                          # (1, c_tile, 1)
        o_ref[...] = acc.astype(o_ref.dtype)

    return kernel


# ---------------------------------------------------------------------------
# Tiling / VMEM sizing (generation-aware)
# ---------------------------------------------------------------------------
def _vmem_total_cap() -> int:
    """Total resident VMEM budget in bytes, derived from the actual chip generation."""
    phys = 128 << 20
    try:
        info = pltpu.get_tpu_info()
        phys = int(getattr(info, "vmem_capacity_bytes", phys)) or phys
    except Exception:
        phys = 64 << 20            # unknown -> assume the tightest (v7x-class, 64 MiB) budget
    if phys <= (64 << 20):         # v7x: 64 MiB physical per TensorCore -> leave headroom
        cap = 48 << 20
    else:                          # v5e / v6e: 128 MiB physical
        cap = 64 << 20
    return max(16 << 20, min(cap, (phys * 3) // 4))


def _pick_tiles(B: int, C: int, T: int, itemsize: int, total_cap: int):
    """Pick (b_tile, c_tile) so the per-step resident footprint fits the VMEM budget.

    Resident per step, in units of one (b_tile, c_tile, T) tile:
      2x input + 2x output double-buffers (native dtype), ~2 rolled-tap temporaries
      (native dtype), ~3 f32 tile-equivalents (accumulator / per-tap term).
    """
    denom = 4 + 2 + 3 * max(1, 4 // itemsize)
    per_buffer = max(64 * 1024, total_cap // denom)     # ~5-8 MiB per I/O buffer

    row_bytes = T * itemsize
    slab = C * row_bytes                                 # one batch element's (C, T) slab
    if slab <= per_buffer:
        c_tile = C
        b_tile = max(1, min(B, per_buffer // max(1, slab)))
    else:
        rows = (per_buffer // max(1, row_bytes)) // 8 * 8
        c_tile = max(8, min(C, rows))
        b_tile = 1
    # TODO(synk): very long T still needs a T-tiled grid with a (K-1) halo; a single
    # (>=8, T) strip must currently fit the VMEM budget.

    # v7x has 2 TensorCores; make sure the "parallel" grid has >= 2 programs when possible.
    if pl.cdiv(B, b_tile) * pl.cdiv(C, c_tile) < 2:
        if B >= 2:
            b_tile = pl.cdiv(B, 2)
        elif C >= 16:
            c_tile = max(8, (C // 2 // 8) * 8)
    return b_tile, c_tile


def _vmem_limit_bytes(b_tile: int, c_tile: int, T: int, itemsize: int, total_cap: int) -> int:
    """vmem_limit_bytes from the actual footprint (not a hard-coded constant)."""
    tile_elems = b_tile * c_tile * T
    tile_bytes = tile_elems * itemsize
    footprint = 6 * tile_bytes               # 2x in + 2x out double-buffers + 2 rolled temporaries
    footprint += 3 * tile_elems * 4          # f32 accumulator / per-tap term intermediates
    footprint += 4 * c_tile * 128 * 4        # lane-padded weight + bias blocks, double-buffered
    return min(total_cap, max(32 << 20, int(footprint * 1.25)))


# ---------------------------------------------------------------------------
# Wrapper
# ---------------------------------------------------------------------------
def lightweight_conv1d(x, weight, bias=None, *, padding=0, num_heads=1,
                       weight_softmax=False):
    """Pallas implementation of LightweightConv1d.forward (inference mode).

    x:      (B, C, T) float array
    weight: (H, 1, K)
    bias:   (C,) or None
    """
    B, C, T = x.shape
    H = num_heads
    K = weight.shape[-1]
    assert C % H == 0, "input_size must be divisible by num_heads"
    # The PyTorch forward does output.view(B, C, T), which requires a T-preserving conv.
    assert K == 2 * padding + 1, "LightweightConv1d forward requires kernel_size == 2*padding + 1"

    w = weight.reshape(H, K).astype(jnp.float32)
    if weight_softmax:
        w = jax.nn.softmax(w, axis=-1)
    # TODO(synk): weight dropout (FairseqDropout) only acts in training mode; inference is identity.

    # Expand head weights to per-channel taps: channel c uses head c % H
    # (matches input.view(-1, H, T) + groups=H in the PyTorch forward).
    w_full = jnp.tile(w, (C // H, 1))                            # (C, K)

    has_bias = bias is not None
    itemsize = jnp.dtype(x.dtype).itemsize

    total_cap = _vmem_total_cap()
    b_tile, c_tile = _pick_tiles(B, C, T, itemsize, total_cap)
    n_b = pl.cdiv(B, b_tile)
    n_c = pl.cdiv(C, c_tile)           # ragged last block handled by Pallas write-masking

    kernel = _make_lconv_kernel(K, padding, T, has_bias)

    # Grid is (channel_tiles, batch_tiles): the weight/bias block index depends only on the
    # OUTER axis, so Pallas elides their re-fetch along the inner (batch) axis.
    in_specs = [
        pl.BlockSpec((b_tile, c_tile, T), lambda c, b: (b, c, 0)),
        pl.BlockSpec((c_tile, K), lambda c, b: (c, 0)),
    ]
    args = [x, w_full]
    if has_bias:
        in_specs.append(pl.BlockSpec((c_tile, 1), lambda c, b: (c, 0)))
        args.append(bias.reshape(C, 1).astype(jnp.float32))

    out = pl.pallas_call(
        kernel,
        out_shape=jax.ShapeDtypeStruct((B, C, T), x.dtype),
        grid=(n_c, n_b),
        in_specs=in_specs,
        out_specs=pl.BlockSpec((b_tile, c_tile, T), lambda c, b: (b, c, 0)),
        compiler_params=pltpu.CompilerParams(
            dimension_semantics=("parallel", "parallel"),
            vmem_limit_bytes=_vmem_limit_bytes(b_tile, c_tile, T, itemsize, total_cap),
        ),
    )(*args)
    return out


# ---------------------------------------------------------------------------
# Reference + self-test
# ---------------------------------------------------------------------------
def _reference_forward(x, weight, bias, padding, num_heads, weight_softmax):
    """Pure-JAX reference mirroring the PyTorch forward (grouped conv1d)."""
    B, C, T = x.shape
    H = num_heads
    w = weight.astype(jnp.float32)
    if weight_softmax:
        w = jax.nn.softmax(w, axis=-1)
    xg = x.reshape(-1, H, T)
    out = jax.lax.conv_general_dilated(
        xg.astype(jnp.float32), w,
        window_strides=(1,), padding=[(padding, padding)],
        dimension_numbers=('NCH', 'OIH', 'NCH'),
        feature_group_count=H)
    out = out.reshape(B, C, -1)
    if bias is not None:
        out = out + bias.astype(jnp.float32).reshape(1, -1, 1)
    return out.astype(x.dtype)


def _run_case(key, *, B, C, T, H, K, P, weight_softmax, use_bias,
              dtype=jnp.float32, atol=1e-5, rtol=1e-5):
    kx, kw, kb = jax.random.split(key, 3)
    x = jax.random.normal(kx, (B, C, T), dtype=jnp.float32).astype(dtype)

    # xavier_uniform init with gain('linear') = 1.0 on weight of shape (H, 1, K)
    fan_in, fan_out = 1 * K, H * K
    bound = math.sqrt(6.0 / (fan_in + fan_out))
    weight = jax.random.uniform(kw, (H, 1, K), dtype=jnp.float32,
                                minval=-bound, maxval=bound)
    # Note: the module zero-inits its bias; a random bias is used here to actually exercise
    # the bias code path numerically.
    bias = (0.1 * jax.random.normal(kb, (C,), dtype=jnp.float32)) if use_bias else None

    out = lightweight_conv1d(x, weight, bias, padding=P, num_heads=H,
                             weight_softmax=weight_softmax)
    out = jax.block_until_ready(out)

    ref = _reference_forward(x, weight, bias, P, H, weight_softmax)
    assert out.shape == (B, C, T), f"bad output shape {out.shape}"
    assert out.dtype == x.dtype, f"bad output dtype {out.dtype}"
    assert jnp.allclose(out.astype(jnp.float32), ref.astype(jnp.float32),
                        atol=atol, rtol=rtol), "mismatch vs reference"


if __name__ == "__main__":
    key = jax.random.PRNGKey(0)
    k1, k2, k3 = jax.random.split(key, 3)

    # Case 1: module defaults (no bias), softmax-normalized weights, K=3 taps, f32.
    _run_case(k1, B=2, C=8, T=128, H=2, K=3, P=1, weight_softmax=True, use_bias=False)
    # Case 2: bias path, one head per channel, wider K=5 taps, raw weights, f32.
    _run_case(k2, B=2, C=4, T=128, H=4, K=5, P=2, weight_softmax=False, use_bias=True)
    # Case 3: bf16 on-chip path (native-dtype rolls, f32 MAC), softmax weights + bias.
    _run_case(k3, B=2, C=8, T=128, H=2, K=3, P=1, weight_softmax=True, use_bias=True,
              dtype=jnp.bfloat16, atol=2e-2, rtol=2e-2)

    print("KERNEL_OK")
</pallas_src>

<mosaic_0001>
module attributes {stable_mosaic.version = 11 : i64} {
  func.func @kernel(%arg0: i32, %arg1: i32, %arg2: memref<1x8x128xf32, #tpu.memory_space<vmem>>, %arg3: memref<8x3xf32, #tpu.memory_space<vmem>>, %arg4: memref<1x8x128xf32, #tpu.memory_space<vmem>>) attributes {dimension_semantics = [#tpu.dimension_semantics<parallel>, #tpu.dimension_semantics<parallel>], iteration_bounds = array<i64: 1, 2>, scalar_prefetch = 0 : i64, scratch_operands = 0 : i64, tpu.core_type = #tpu.core_type<tc>, window_params = [{transform_indices = @transform_0, window_bounds = array<i64: 1, 8, 128>}, {transform_indices = @transform_1, window_bounds = array<i64: 8, 3>}, {transform_indices = @transform_2, window_bounds = array<i64: 1, 8, 128>}]} {
    %c0 = arith.constant 0 : index
    %c0_0 = arith.constant 0 : index
    %c0_1 = arith.constant 0 : index
    %0 = vector.load %arg2[%c0, %c0_0, %c0_1] : memref<1x8x128xf32, #tpu.memory_space<vmem>>, vector<1x8x128xf32>
    %c0_2 = arith.constant 0 : index
    %c0_3 = arith.constant 0 : index
    %1 = vector.load %arg3[%c0_2, %c0_3] : memref<8x3xf32, #tpu.memory_space<vmem>>, vector<8x3xf32>
    %2 = tpu.iota {dimensions = array<i32: 2>} : vector<1x8x128xi32>
    %c1_i32 = arith.constant 1 : i32
    %3 = tpu.dynamic_rotate %0 by %c1_i32 dim 2 : vector<1x8x128xf32>, i32 -> vector<1x8x128xf32>
    %c1_i32_4 = arith.constant 1 : i32
    %4 = vector.broadcast %c1_i32_4 : i32 to vector<1x8x128xi32>
    %5 = arith.cmpi sge, %2, %4 : vector<1x8x128xi32>
    %cst = arith.constant 0.000000e+00 : f32
    %6 = vector.broadcast %cst : f32 to vector<1x8x128xf32>
    %7 = arith.select %5, %3, %6 : vector<1x8x128xi1>, vector<1x8x128xf32>
    %8 = vector.extract_strided_slice %1 {offsets = [0, 0], sizes = [8, 1], strides = [1, 1]} : vector<8x3xf32> to vector<8x1xf32>
    %9 = vector.shape_cast %8 : vector<8x1xf32> to vector<1x8x1xf32>
    %10 = vector.broadcast %9 : vector<1x8x1xf32> to vector<1x8x128xf32>
    %11 = arith.mulf %7, %10 : vector<1x8x128xf32>
    %12 = vector.extract_strided_slice %1 {offsets = [0, 1], sizes = [8, 1], strides = [1, 1]} : vector<8x3xf32> to vector<8x1xf32>
    %13 = vector.shape_cast %12 : vector<8x1xf32> to vector<1x8x1xf32>
    %14 = vector.broadcast %13 : vector<1x8x1xf32> to vector<1x8x128xf32>
    %15 = arith.mulf %0, %14 : vector<1x8x128xf32>
    %16 = arith.addf %11, %15 : vector<1x8x128xf32>
    %c127_i32 = arith.constant 127 : i32
    %17 = tpu.dynamic_rotate %0 by %c127_i32 dim 2 : vector<1x8x128xf32>, i32 -> vector<1x8x128xf32>
    %c127_i32_5 = arith.constant 127 : i32
    %18 = vector.broadcast %c127_i32_5 : i32 to vector<1x8x128xi32>
    %19 = arith.cmpi slt, %2, %18 : vector<1x8x128xi32>
    %cst_6 = arith.constant 0.000000e+00 : f32
    %20 = vector.broadcast %cst_6 : f32 to vector<1x8x128xf32>
    %21 = arith.select %19, %17, %20 : vector<1x8x128xi1>, vector<1x8x128xf32>
    %22 = vector.extract_strided_slice %1 {offsets = [0, 2], sizes = [8, 1], strides = [1, 1]} : vector<8x3xf32> to vector<8x1xf32>
    %23 = vector.shape_cast %22 : vector<8x1xf32> to vector<1x8x1xf32>
    %24 = vector.broadcast %23 : vector<1x8x1xf32> to vector<1x8x128xf32>
    %25 = arith.mulf %21, %24 : vector<1x8x128xf32>
    %26 = arith.addf %16, %25 : vector<1x8x128xf32>
    %c0_7 = arith.constant 0 : index
    %c0_8 = arith.constant 0 : index
    %c0_9 = arith.constant 0 : index
    %27 = vector.load %arg4[%c0_7, %c0_8, %c0_9] : memref<1x8x128xf32, #tpu.memory_space<vmem>>, vector<1x8x128xf32>
    tpu.vector_store %arg4[%c0_7, %c0_8, %c0_9], %26 {strides = array<i32>} : memref<1x8x128xf32, #tpu.memory_space<vmem>>, vector<1x8x128xf32>,
    return
  }
  func.func @transform_0(%arg0: i32, %arg1: i32) -> (i32, i32, i32) {
    %c0_i32 = arith.constant 0 : i32
    %c0_i32_0 = arith.constant 0 : i32
    return %arg1, %arg0, %c0_i32 : i32, i32, i32
  }
  func.func @transform_1(%arg0: i32, %arg1: i32) -> (i32, i32) {
    %c0_i32 = arith.constant 0 : i32
    %c0_i32_0 = arith.constant 0 : i32
    return %arg0, %c0_i32 : i32, i32
  }
  func.func @transform_2(%arg0: i32, %arg1: i32) -> (i32, i32, i32) {
    %c0_i32 = arith.constant 0 : i32
    %c0_i32_0 = arith.constant 0 : i32
    return %arg1, %arg0, %c0_i32 : i32, i32, i32
  }
}

</mosaic_0001>

<bundles_post_ra>
// kernel: tpu_custom_call.1
= control target key start
LH: loop header
LB: loop body
LE: loop exit
PB: predicated region body
PF: predicated region fallthrough
CT: control target
= control target key end

     0   :  { %7 = vsyncpa [#allocation3], 0  ;;  %s692_s0 = inlined_call_operand.hbm [shape: f32[2,8,128], index: 0, kind: input, shape index: {}]   ;;  %s693_s1 = inlined_call_operand.vmem [shape: f32[8,3], index: 1, kind: input, shape index: {}]   ;;  %s694_s2 = inlined_call_operand.hbm [shape: f32[2,8,128], index: 2, kind: output, shape index: {}]  }
   0x1   :  { %9 = vsyncpa [#allocation3 + $0x1], 0 }
   0x2   :  { %10 = vsyncpa [#allocation4], 0 }
   0x3   :  { %12 = vsyncpa [#allocation4 + $0x1], 0  ;;  %s551_s9 = smov 0   ;;  %s553_s10 = smov 0  }
   0x4   :  { %s555_s11 = smov 0   ;;  %s557_s12 = smov 0  }
   0x5   :  { %s559_s13 = smov 0   ;;  %s561_s14 = smov 0  }
   0x6 LB: > { %s334_s15 = sadd.s32 4294967295, %s527_s14   ;;  %s335_s16 = sadd.s32 4294967294, %s527_s14   ;;  %s527_s14 = sphi %s561_s14, %s18_s14   ;;  %s523_s13 = sphi %s559_s13, %s706_s13   ;;  %s519_s12 = sphi %s557_s12, %s705_s12   ;;  %s515_s11 = sphi %s555_s11, %s704_s11   ;;  %s511_s10 = sphi %s553_s10, %s703_s10   ;;  %s507_s9 = sphi %s551_s9, %s702_s9  }
   0x7   : > { %s27_s17 = sadd.s32 1, %s523_s13  ;;  %s39_s18 = sadd.s32 1, %s515_s11 }
   0x8   : > { %p28_p0 = scmp.ge.s32.totalorder %s27_s17, 2  ;;  %p46_p1 = scmp.ne.s32.totalorder %s515_s11, %s511_s10 }
   0x9   : > { %p47_p2 = scmp.eq.s32.totalorder %s527_s14, 0  ;;  %p52_p3 = scmp.ne.s32.totalorder %s511_s10, %s507_s9 }
   0xa   : > { %s708_s17 = smov (%p28_p0, %s27_s17), 0  ;;  %p53_p5 = scmp.eq.s32.totalorder %s334_s15, 0 }
   0xb   : > { %p592_p4 = por %p47_p2, %p46_p1  ;;  %s34_s20 = ssub.s32 %s523_s13, %s708_s17 }
   0xc   : > { %p104_p6 = scmp.eq.s32.totalorder %s334_s15, 1  ;;  %p37_p7 = scmp.eq.s32.totalorder %s34_s20, 0 }
   0xd   : > { %p598_p8 = por %p53_p5, %p52_p3  ;;  %p110_p10 = scmp.eq.s32.totalorder %s335_s16, 1 }
   0xe   : > { %p602_p9 = por %p104_p6, %p46_p1  ;;  %p360_p13 = scmp.lt.s32.totalorder %s527_s14, 2 }
   0xf   : > { %s607_s23 = scalar_select %p37_p7, %s515_s11, %s39_s18  }
  0x10   : > { %p609_p11 = por %p110_p10, %p52_p3  ;;  %s137_s25 = sand.u32 1, %s515_s11  }
  0x11   : > { %s339_s26 = sshll.u32 %s137_s25, 3  ;;  %s340_s27 = sshll.u32 %s523_s13, 7 }
  0x12   : > { %s698_s24 = scalar_select %p609_p11, 1, 0 }
  0x13   : > { %s147_s30 = scalar_lea.hbm %s692_s0, %s340_s27  ;;  %s141_s3 = scalar_lea.vmem [#allocation2], %s339_s26 }
  0x14   : > { %s149_s4 = sshll.u32 %s141_s3, 4  ;;  %p622_p0 = pnand %p360_p13, %p592_p4  ;;  %s150_s4 = int_to_ptr.vmem [resolvable:$true] %s149_s4 }
  0x15   : > { %p341_p1 = scmp.ge.s32.totalorder %s527_s14, 1  ;;  %p154_p2 = scmp.lt.s32.totalorder %s527_s14, 3 }
  0x16   : > { %s138_s6 = scalar_lea.sflag [#allocation3], %s137_s25  ;;  %p421_p3 = pneg %p622_p0 }
  0x17   : > { %s432_s7 = scalar_lea.vmem %s150_s4, 128  ;;  %s529_s8 = smov [#allocation2]  }
  0x18   : > { %p433_p5 = scmp.ne.s32.totalorder %s150_s4, %s432_s7  ;;  %s437_s15 = sshll.u32 %s529_s8, 4  ;;  %s438_s15 = int_to_ptr.vmem [resolvable:$false] %s437_s15 }
  0x19   : > { %s439_s16 = scalar_lea.vmem %s438_s15, 256  ;;  %p440_p10 = scmp.lt.s32.totalorder %s150_s4, %s438_s15 }
  0x1a   : > { %p435_p6 = pnand %p433_p5, %p421_p3  ;;  %p441_p12 = scmp.lt.s32.totalorder %s439_s16, %s432_s7 }
  0x1c   : > { %p436_p7 = pneg %p435_p6  ;;  %p442_p4 = por %p441_p12, %p440_p10 }
  0x1e   : > { %p443_p13 = pnand %p442_p4, %p436_p7 }
  0x20   : > { %446 = shalt.err (!%p443_p13)
}
  0x21   : > { %355 = dma.hbm_to_vmem [thread:$0]  (!%p622_p0), %s147_s30, 128, %s150_s4, %s138_s6  }
  0x22   : > { %p155_p11 = pnand %p341_p1, %p154_p2 }
  0x23   : > { %s637_s18 = sand.u32 (!%p155_p11), 1, %s511_s10  }
  0x24   : > { %158 = sbr.rel (%p155_p11) target bundleno = 194 (0xc2), region = 28  ;;  %s342_s19 = sshll.u32 (!%p155_p11), %s637_s18, 3 }
  0x25   : > { %s161_s20 = scalar_lea.sflag (!%p155_p11), [#allocation3], %s637_s18  ;;  %s164_s25 = scalar_lea.vmem (!%p155_p11), [#allocation2], %s342_s19 }
  0x29   : > { %498 = dma.done.wait (%p598_p8), %s161_s20, 128  }
  0x2a   : > { %500 = vsyncadd (%p598_p8), %s161_s20, 4294967168  ;;  %v530_v0 = vmov 2   ;;  %v531_v1 = vmov 0   ;;  %v194_v2 = vld [vmem:[%s693_s1] sm:$0xff]  ;;  %v532_v4 = vmov 1   ;;  %s533_s28 = smov 1   ;;  %v195_v5 = vlaneseq }
  0x2b   : > { %417 = vset.pattern.permute.xlu1 %v530_v0  ;;  %415 = vset.pattern.permute.xlu0 %v531_v1  ;;  %v193_v3 = vld [vmem:[%s164_s25] sm:$0xff]  ;;  %s534_s29 = smov 127   ;;  %s345_s21 = sshll.u32 %s519_s12, 7 }
  0x2c   : > { %218 = vperm.xlu1 %417, %v194_v2   ;;  %203 = vperm.xlu0 %415, %v194_v2   ;;  %v196_v6 = vand.u32 127, %v195_v5  ;;  %s188_s30 = scalar_lea.vmem [#allocation5], %s342_s19  ;;  %s237_s6 = scalar_lea.hbm %s694_s2, %s345_s21 }
  0x2d   : > { %s239_s3 = sshll.u32 %s188_s30, 4  ;;  %s225_s7 = scalar_lea.sflag [#allocation4], %s637_s18  ;;  %s240_s3 = int_to_ptr.vmem [resolvable:$true] %s239_s3 }
  0x2e   : > { %vm199_vm0 = vcmp.ge.s32.totalorder %v196_v6, 1  ;;  %vm215_vm1 = vcmp.lt.s32.totalorder %v196_v6, 127  ;;  %s447_s8 = scalar_lea.vmem %s240_s3, 128  ;;  %s535_s15 = smov [#allocation5]  }
  0x2f   : > { %p448_p8 = scmp.ne.s32.totalorder %s240_s3, %s447_s8  ;;  %s451_s12 = sshll.u32 %s535_s15, 4  ;;  %s452_s12 = int_to_ptr.vmem [resolvable:$false] %s451_s12 }
  0x30   : > { %416 = vset.pattern.permute.xlu0 %v532_v4  ;;  %197 = vrot.lane.b32.xlu1 %v193_v3, %s533_s28  ;;  %s453_s16 = scalar_lea.vmem %s452_s12, 256  ;;  %p454_p0 = scmp.lt.s32.totalorder %s240_s3, %s452_s12 }
  0x31   : > { %208 = vperm.xlu0 %416, %v194_v2   ;;  %p449_p11 = pnand %p448_p8, %p602_p9  ;;  %p455_p1 = scmp.lt.s32.totalorder %s453_s16, %s447_s8 }
  0x33   : > { %p450_p12 = pneg %p449_p11  ;;  %p456_p2 = por %p455_p1, %p454_p0 }
  0x34   : > { %213 = vrot.lane.b32.xlu1 %v193_v3, %s534_s29 }
  0x35   : > { %418 = vset.pattern.permute.xlu0 %v530_v0  ;;  %p457_p3 = pnand %p456_p2, %p450_p12 }
  0xa7   : > { %v219_v7 = vpop.permute.xlu1 %218  ;;  %v204_v8 = vpop.permute.xlu0 %203 }
  0xab   : > { %v198_v9 = vpop.permute.xlu1 %197 }
  0xac   : > { %v200_v10 = vsel %vm199_vm0, %v198_v9, 0.0  ;;  %v209_v11 = vpop.permute.xlu0 %208 }
  0xad   : > { %v206_v12 = vmul.f32 %v204_v8, %v200_v10  ;;  %v211_v13 = vmul.f32 %v209_v11, %v193_v3 }
  0xaf   : > { %v214_v14 = vpop.permute.xlu1 %213  ;;  %v212_v16 = vadd.f32 %v211_v13, %v206_v12 }
  0xb0   : > { %v216_v15 = vsel %vm215_vm1, %v214_v14, 0.0 }
  0xb1   : > { %v221_v17 = vmul.f32 %v219_v7, %v216_v15 }
  0xb3   : > { %v222_v18 = vadd.f32 %v221_v17, %v212_v16 }
  0xb5   : > { %223 = vst [vmem:[%s188_s30] sm:$0xff] %v222_v18 }
  0xb6   : > { %460 = shalt.err (!%p457_p3)
}
  0xb7   : > { %s461_s19 = scalar_lea.hbm %s237_s6, 128  ;;  %s465_s25 = scalar_lea.hbm %s694_s2, 256 }
  0xb8   : > { %p462_p5 = scmp.ne.s32.totalorder %s237_s6, %s461_s19  ;;  %p466_p10 = scmp.lt.s32.totalorder %s237_s6, %s694_s2 }
  0xb9   : > { %p467_p4 = scmp.lt.s32.totalorder %s465_s25, %s461_s19 }
  0xba   : > { %p463_p6 = pnand %p462_p5, %p602_p9 }
  0xbb   : > { %p468_p13 = por %p467_p4, %p466_p10 }
  0xbc   : > { %p464_p7 = pneg %p463_p6 }
  0xbe   : > { %p469_p8 = pnand %p468_p13, %p464_p7 }
  0xc0   : > { %472 = shalt.err (!%p469_p8)
}
  0xc1   : > { %350 = dma.vmem_to_hbm [thread:$0]  (%p602_p9), %s240_s3, 128, %s237_s6, %s225_s7  }
  0xc2 PF: > { %s251_s28 = sand.u32 1, %s507_s9   ;;  %p700_p11 = scmp.ne.s32.totalorder %s698_s24, 0 }
  0xc3   : > { %p701_p12 = scmp.ge.s32.totalorder %s527_s14, 2  ;;  %s252_s29 = scalar_lea.sflag [#allocation4], %s251_s28 }
  0xc5   : > { %p357_p0 = pnand %p701_p12, %p700_p11 }
  0xc7   : > { %p358_p1 = pneg %p357_p0 }
  0xc9   : > { %502 = dma.done.wait (%p358_p1), %s252_s29, 128  }
  0xca   : > { %504 = vsyncadd (%p358_p1), %s252_s29, 4294967168  ;;  %s18_s14 = sadd.s32 1, %s527_s14   ;;  %s702_s9 = smov %s511_s10 }
  0xcb   : > { %p15_p2 = scmp.ge.s32.totalorder %s18_s14, 4   ;;  %s703_s10 = smov %s515_s11 }
  0xcc   : > { %s704_s11 = smov %s607_s23  ;;  %s705_s12 = smov %s523_s13 }
  0xcd   : > { %s706_s13 = smov %s708_s17  ;;  %17 = sbr.rel (!%p15_p2) target bundleno = 6 (0x6), region = 76 }
  0xd2   :  { %257 = vsyncpa [#allocation3], 1 }
  0xd3   :  { %259 = vsyncpa [#allocation3 + $0x1], 1 }
  0xd4   :  { %260 = vsyncpa [#allocation4], 1 }
  0xd5   :  { %262 = vsyncpa [#allocation4 + $0x1], 1 }

</bundles_post_ra>
